<compile_context>
chip_gen: v7x
topology: tpu7x:2x2x1
jax: 0.10.0
libtpu: 0.0.40
codegen_flags: <defaults>
</compile_context>

<pallas_src>
import functools

import jax
import jax.numpy as jnp
import numpy as np
from jax import lax
from jax.experimental import pallas as pl
from jax.experimental.pallas import tpu as pltpu


# ---------------------------------------------------------------------------
# VMEM budgeting helpers
# ---------------------------------------------------------------------------

def _vmem_capacity_bytes():
    """Physical VMEM per TensorCore (64 MiB v7x, 128 MiB v5e/v6e)."""
    try:
        info = pltpu.get_tpu_info()
        cap = getattr(info, "vmem_capacity_bytes", None)
        if cap:
            return int(cap)
    except Exception:
        pass
    return 128 * 1024 * 1024


def _kernel_vmem_bytes(tc, b, h, n_dirs, gx_item, out_item, param_item):
    """Approximate VMEM footprint of the recurrence kernel for one grid step."""
    g = 4 * h
    gx_tiles = n_dirs * 2 * tc * b * g * gx_item      # double-buffered gx stream
    out_tiles = n_dirs * 2 * tc * b * h * out_item    # double-buffered out stream
    weights = n_dirs * 1 * h * g * param_item         # single-buffered (Buffered(1))
    state = n_dirs * 2 * b * h * 4                    # h/c f32 scratch
    return gx_tiles + out_tiles + weights + state


def _pick_time_chunk(t, b_pad, h, n_dirs, gx_item, out_item, param_item,
                     requested=None):
    """Largest power-of-two time chunk that fits ~half of this chip's VMEM."""
    if requested is not None:
        return max(1, min(int(requested), t))
    budget = _vmem_capacity_bytes() // 2     # leave headroom for compiler scratch
    tc = 1
    cand = 2
    while cand <= 256 and cand <= t:
        if _kernel_vmem_bytes(cand, b_pad, h, n_dirs,
                              gx_item, out_item, param_item) <= budget:
            tc = cand
            cand *= 2
        else:
            break
    return tc


# ---------------------------------------------------------------------------
# Kernels
# ---------------------------------------------------------------------------

def _lstm_cell(gx, h, c, w_hhT, H):
    """One LSTM cell update.

    The 0.5 rescale that turns sigmoid(z) into 0.5*(tanh(z/2)+1) has been folded
    into the i/f/o rows of W_ih and W_hh at prep time, so a single full-width
    EUP tanh pass covers all four gates and no per-step scale multiply is needed.
    """
    gates = gx + jnp.dot(h.astype(w_hhT.dtype), w_hhT,
                         preferred_element_type=jnp.float32)
    t = jnp.tanh(gates)                                # one EUP pass over (B, 4H)
    i_g = 0.5 * (t[:, 0 * H:1 * H] + 1.0)
    f_g = 0.5 * (t[:, 1 * H:2 * H] + 1.0)
    g_g = t[:, 2 * H:3 * H]
    o_g = 0.5 * (t[:, 3 * H:4 * H] + 1.0)
    c_new = f_g * c + i_g * g_g
    h_new = o_g * jnp.tanh(c_new)
    return h_new, c_new


def _lstm_uni_kernel(gx_ref, whhT_ref, out_ref, h_sc, c_sc, *, tc, unroll):
    """Forward-direction LSTM recurrence over one chunk of `tc` timesteps."""
    @pl.when(pl.program_id(0) == 0)
    def _():
        h_sc[...] = jnp.zeros_like(h_sc)
        c_sc[...] = jnp.zeros_like(c_sc)

    H = h_sc.shape[-1]
    w = whhT_ref[...]                                  # loop-invariant

    def step(i, carry):
        gx = gx_ref[i].astype(jnp.float32)             # (B, 4H)
        h_new, c_new = _lstm_cell(gx, h_sc[...], c_sc[...], w, H)
        h_sc[...] = h_new
        c_sc[...] = c_new
        out_ref[i] = h_new.astype(out_ref.dtype)
        return carry

    # Modest unroll: full unroll at production 4H would spill vregs.
    lax.fori_loop(0, tc, step, 0, unroll=unroll)


def _lstm_bidir_kernel(gx_f_ref, gx_b_ref, wf_ref, wb_ref,
                       out_f_ref, out_b_ref,
                       h_f, c_f, h_b, c_b, *, tc, unroll):
    """Fused bidirectional recurrence: forward chunk c and backward chunk
    n_chunks-1-c are processed in the same grid step as two independent
    dependence chains (doubles ILP on the latency-bound serial path)."""
    @pl.when(pl.program_id(0) == 0)
    def _():
        h_f[...] = jnp.zeros_like(h_f)
        c_f[...] = jnp.zeros_like(c_f)
        h_b[...] = jnp.zeros_like(h_b)
        c_b[...] = jnp.zeros_like(c_b)

    H = h_f.shape[-1]
    w_f = wf_ref[...]
    w_b = wb_ref[...]

    def step(i, carry):
        t_f = i                                        # forward: chunk start -> end
        t_b = tc - 1 - i                               # backward: chunk end -> start
        hf, cf = _lstm_cell(gx_f_ref[t_f].astype(jnp.float32),
                            h_f[...], c_f[...], w_f, H)
        hb, cb = _lstm_cell(gx_b_ref[t_b].astype(jnp.float32),
                            h_b[...], c_b[...], w_b, H)
        h_f[...] = hf
        c_f[...] = cf
        h_b[...] = hb
        c_b[...] = cb
        out_f_ref[t_f] = hf.astype(out_f_ref.dtype)
        out_b_ref[t_b] = hb.astype(out_b_ref.dtype)
        return carry

    lax.fori_loop(0, tc, step, 0, unroll=unroll)


# ---------------------------------------------------------------------------
# Wrapper
# ---------------------------------------------------------------------------

def _fold_gate_scale(w):
    """Scale i/f/o gate rows of a (4H, K) PyTorch-layout weight by 0.5.

    Exact transform: 0.5*(x@W^T) == x@(0.5*W)^T, and 0.5 is a power of two so
    the scaling itself is rounding-free.  The g-gate rows stay unscaled.
    """
    G = w.shape[0]
    H = G // 4
    row = jnp.arange(G)[:, None]
    g_rows = (row >= 2 * H) & (row < 3 * H)
    return jnp.where(g_rows, w, 0.5 * w)


def brnn_forward(x, params, bidirectional, *, time_chunk=None,
                 param_dtype=jnp.bfloat16):
    """Equivalent of BRNN.forward for x of shape (T, B, input_size)."""
    T, B, I = x.shape
    H = params["w_hh_f"].shape[1]
    G = 4 * H
    n_dirs = 2 if bidirectional else 1
    gx_dtype = x.dtype
    gx_item = jnp.dtype(gx_dtype).itemsize
    param_item = jnp.dtype(param_dtype).itemsize

    # Layout hygiene: pad batch to a sublane multiple (8).  Zero batch rows stay
    # exactly zero through a bias-free LSTM with zero initial state, so padding
    # never perturbs the real rows (same argument for zero time padding — and it
    # survives the weight folding, which only rescales weights).
    B_pad = -(-B // 8) * 8

    tc = _pick_time_chunk(T, B_pad, H, n_dirs, gx_item, gx_item, param_item,
                          requested=time_chunk)
    T_pad = -(-T // tc) * tc
    n_chunks = T_pad // tc

    if (T_pad, B_pad) != (T, B):
        x = jnp.pad(x, ((0, T_pad - T), (0, B_pad - B), (0, 0)))

    def prep(w_ih, w_hh):
        # One-time weight prep: fold the 0.5 gate scale, transpose, cast to the
        # MXU dtype.  Then hoist the input projection as one big GEMM (no time
        # dependence) so the kernel only runs the serial part.
        w_ihT = _fold_gate_scale(w_ih).T.astype(param_dtype)   # (I, 4H)
        w_hhT = _fold_gate_scale(w_hh).T.astype(param_dtype)   # (H, 4H)
        gx = jnp.dot(x.reshape(T_pad * B_pad, I).astype(param_dtype), w_ihT,
                     preferred_element_type=jnp.float32)
        return gx.reshape(T_pad, B_pad, G).astype(gx_dtype), w_hhT

    # Explicit scoped-VMEM limit sized from the actual tiles (+ headroom),
    # capped below physical capacity.
    needed = _kernel_vmem_bytes(tc, B_pad, H, n_dirs, gx_item, gx_item,
                                param_item)
    cap = _vmem_capacity_bytes()
    vmem_limit = int(min(int(0.9 * cap), max(2 * needed + (4 << 20), 32 << 20)))

    fwd_idx = lambda c: (c, 0, 0)
    weight_spec = lambda: pl.BlockSpec((H, G), lambda c: (0, 0),
                                       pipeline_mode=pl.Buffered(1))
    unroll = int(min(tc, 4))   # vreg-pressure control at production 4H
    compiler_params = pltpu.CompilerParams(
        # Time recurrence is strictly sequential (state carried in scratch).
        dimension_semantics=("arbitrary",),
        vmem_limit_bytes=vmem_limit)

    gx_f, w_hhT_f = prep(params["w_ih_f"], params["w_hh_f"])

    if not bidirectional:
        out = pl.pallas_call(
            functools.partial(_lstm_uni_kernel, tc=tc, unroll=unroll),
            out_shape=jax.ShapeDtypeStruct((T_pad, B_pad, H), gx_dtype),
            grid_spec=pltpu.PrefetchScalarGridSpec(
                num_scalar_prefetch=0,
                grid=(n_chunks,),
                in_specs=[
                    pl.BlockSpec((tc, B_pad, G), fwd_idx),
                    weight_spec(),
                ],
                out_specs=pl.BlockSpec((tc, B_pad, H), fwd_idx),
                scratch_shapes=[
                    pltpu.VMEM((B_pad, H), jnp.float32),   # h
                    pltpu.VMEM((B_pad, H), jnp.float32),   # c
                ],
            ),
            compiler_params=compiler_params,
        )(gx_f, w_hhT_f)
        return out[:T, :B]

    gx_b, w_hhT_b = prep(params["w_ih_b"], params["w_hh_b"])
    bwd_idx = lambda c: (n_chunks - 1 - c, 0, 0)

    out_f, out_b = pl.pallas_call(
        functools.partial(_lstm_bidir_kernel, tc=tc, unroll=unroll),
        out_shape=(jax.ShapeDtypeStruct((T_pad, B_pad, H), gx_dtype),
                   jax.ShapeDtypeStruct((T_pad, B_pad, H), gx_dtype)),
        grid_spec=pltpu.PrefetchScalarGridSpec(
            num_scalar_prefetch=0,
            grid=(n_chunks,),
            in_specs=[
                pl.BlockSpec((tc, B_pad, G), fwd_idx),
                pl.BlockSpec((tc, B_pad, G), bwd_idx),
                weight_spec(),
                weight_spec(),
            ],
            out_specs=(pl.BlockSpec((tc, B_pad, H), fwd_idx),
                       pl.BlockSpec((tc, B_pad, H), bwd_idx)),
            scratch_shapes=[
                pltpu.VMEM((B_pad, H), jnp.float32),   # h forward
                pltpu.VMEM((B_pad, H), jnp.float32),   # c forward
                pltpu.VMEM((B_pad, H), jnp.float32),   # h backward
                pltpu.VMEM((B_pad, H), jnp.float32),   # c backward
            ],
        ),
        compiler_params=compiler_params,
    )(gx_f, gx_b, w_hhT_f, w_hhT_b)

    # BRNN sums the two directions; one cheap fused elementwise pass.
    return (out_f + out_b)[:T, :B]


# ---------------------------------------------------------------------------
# Params + reference
# ---------------------------------------------------------------------------

def init_params(key, input_size, hidden_size, bidirectional):
    """Deterministic init mimicking PyTorch LSTM U(-1/sqrt(H), 1/sqrt(H))."""
    k = 1.0 / np.sqrt(hidden_size)
    keys = jax.random.split(key, 4)
    p = {
        "w_ih_f": jax.random.uniform(keys[0], (4 * hidden_size, input_size),
                                     jnp.float32, -k, k),
        "w_hh_f": jax.random.uniform(keys[1], (4 * hidden_size, hidden_size),
                                     jnp.float32, -k, k),
    }
    if bidirectional:
        p["w_ih_b"] = jax.random.uniform(keys[2], (4 * hidden_size, input_size),
                                         jnp.float32, -k, k)
        p["w_hh_b"] = jax.random.uniform(keys[3], (4 * hidden_size, hidden_size),
                                         jnp.float32, -k, k)
    return p


def _lstm_ref(x, w_ih, w_hh, reverse):
    """Pure-JAX reference (lax.scan) for correctness check."""
    T, B, I = x.shape
    H = w_hh.shape[1]
    xs = x[::-1] if reverse else x

    def step(carry, x_t):
        h, c = carry
        gates = x_t @ w_ih.T + h @ w_hh.T
        i = jax.nn.sigmoid(gates[:, 0 * H:1 * H])
        f = jax.nn.sigmoid(gates[:, 1 * H:2 * H])
        g = jnp.tanh(gates[:, 2 * H:3 * H])
        o = jax.nn.sigmoid(gates[:, 3 * H:4 * H])
        c = f * c + i * g
        h = o * jnp.tanh(c)
        return (h, c), h

    init = (jnp.zeros((B, H), jnp.float32), jnp.zeros((B, H), jnp.float32))
    _, hs = lax.scan(step, init, xs)
    return hs[::-1] if reverse else hs


def brnn_ref(x, params, bidirectional):
    out = _lstm_ref(x, params["w_ih_f"], params["w_hh_f"], reverse=False)
    if bidirectional:
        out = out + _lstm_ref(x, params["w_ih_b"], params["w_hh_b"], reverse=True)
    return out


# ---------------------------------------------------------------------------
# Self-test
# ---------------------------------------------------------------------------

if __name__ == "__main__":
    # Small shapes: seq=8, batch=2, input_size=16, hidden_size=32.
    T, B, I, H = 8, 2, 16, 32

    key = jax.random.PRNGKey(0)
    kx, kp = jax.random.split(key)
    x = jax.random.normal(kx, (T, B, I), dtype=jnp.float32)
    params_bi = init_params(kp, I, H, bidirectional=True)
    params_uni = {k: v for k, v in params_bi.items() if k.endswith("_f")}

    # --- bidirectional, f32 weights: tight numerical check ------------------
    # time_chunk=4 -> grid of 2 chunks, exercising the cross-chunk state carry.
    fwd_bi_f32 = jax.jit(functools.partial(
        brnn_forward, bidirectional=True, time_chunk=4,
        param_dtype=jnp.float32))
    out_bi = jax.block_until_ready(fwd_bi_f32(x, params_bi))
    ref_bi = jax.block_until_ready(brnn_ref(x, params_bi, True))
    assert out_bi.shape == (T, B, H)
    np.testing.assert_allclose(np.asarray(out_bi), np.asarray(ref_bi),
                               rtol=1e-4, atol=1e-4)

    # --- unidirectional, f32 weights ----------------------------------------
    fwd_uni_f32 = jax.jit(functools.partial(
        brnn_forward, bidirectional=False, time_chunk=4,
        param_dtype=jnp.float32))
    out_uni = jax.block_until_ready(fwd_uni_f32(x, params_uni))
    ref_uni = jax.block_until_ready(brnn_ref(x, params_uni, False))
    assert out_uni.shape == (T, B, H)
    np.testing.assert_allclose(np.asarray(out_uni), np.asarray(ref_uni),
                               rtol=1e-4, atol=1e-4)

    # --- bidirectional, default bf16 weights (MXU-native path), loose check --
    fwd_bi_bf16 = jax.jit(functools.partial(
        brnn_forward, bidirectional=True, time_chunk=4))
    out_bf16 = jax.block_until_ready(fwd_bi_bf16(x, params_bi))
    np.testing.assert_allclose(np.asarray(out_bf16), np.asarray(ref_bi),
                               rtol=5e-2, atol=5e-2)

    print("KERNEL_OK")
</pallas_src>

<mosaic_0001>
module attributes {stable_mosaic.version = 11 : i64} {
  func.func @_lstm_bidir_kernel(%arg0: i32, %arg1: memref<4x8x128xf32, #tpu.memory_space<vmem>>, %arg2: memref<4x8x128xf32, #tpu.memory_space<vmem>>, %arg3: memref<32x128xf32, #tpu.memory_space<vmem>>, %arg4: memref<32x128xf32, #tpu.memory_space<vmem>>, %arg5: memref<4x8x32xf32, #tpu.memory_space<vmem>>, %arg6: memref<4x8x32xf32, #tpu.memory_space<vmem>>, %arg7: memref<8x32xf32, #tpu.memory_space<vmem>>, %arg8: memref<8x32xf32, #tpu.memory_space<vmem>>, %arg9: memref<8x32xf32, #tpu.memory_space<vmem>>, %arg10: memref<8x32xf32, #tpu.memory_space<vmem>>) attributes {dimension_semantics = [#tpu.dimension_semantics<arbitrary>], iteration_bounds = array<i64: 2>, scalar_prefetch = 0 : i64, scratch_operands = 4 : i64, tpu.core_type = #tpu.core_type<tc>, window_params = [{transform_indices = @transform_0, window_bounds = array<i64: 4, 8, 128>}, {transform_indices = @transform_1, window_bounds = array<i64: 4, 8, 128>}, {pipeline_mode = #tpu.pipeline_mode<synchronous>, transform_indices = @transform_2, window_bounds = array<i64: 32, 128>}, {pipeline_mode = #tpu.pipeline_mode<synchronous>, transform_indices = @transform_3, window_bounds = array<i64: 32, 128>}, {transform_indices = @transform_4, window_bounds = array<i64: 4, 8, 32>}, {transform_indices = @transform_5, window_bounds = array<i64: 4, 8, 32>}]} {
    %c0_i32 = arith.constant 0 : i32
    %0 = arith.cmpi eq, %arg0, %c0_i32 : i32
    %1 = arith.extui %0 : i1 to i32
    %c0_i32_0 = arith.constant 0 : i32
    %2 = arith.cmpi ne, %1, %c0_i32_0 : i32
    scf.if %2 {
      %cst_160 = arith.constant 0.000000e+00 : f32
      %289 = vector.broadcast %cst_160 : f32 to vector<8x32xf32>
      %c0_161 = arith.constant 0 : index
      %c0_162 = arith.constant 0 : index
      %290 = vector.load %arg7[%c0_161, %c0_162] : memref<8x32xf32, #tpu.memory_space<vmem>>, vector<8x32xf32>
      tpu.vector_store %arg7[%c0_161, %c0_162], %289 {strides = array<i32>} : memref<8x32xf32, #tpu.memory_space<vmem>>, vector<8x32xf32>,
      %cst_163 = arith.constant 0.000000e+00 : f32
      %291 = vector.broadcast %cst_163 : f32 to vector<8x32xf32>
      %c0_164 = arith.constant 0 : index
      %c0_165 = arith.constant 0 : index
      %292 = vector.load %arg8[%c0_164, %c0_165] : memref<8x32xf32, #tpu.memory_space<vmem>>, vector<8x32xf32>
      tpu.vector_store %arg8[%c0_164, %c0_165], %291 {strides = array<i32>} : memref<8x32xf32, #tpu.memory_space<vmem>>, vector<8x32xf32>,
      %cst_166 = arith.constant 0.000000e+00 : f32
      %293 = vector.broadcast %cst_166 : f32 to vector<8x32xf32>
      %c0_167 = arith.constant 0 : index
      %c0_168 = arith.constant 0 : index
      %294 = vector.load %arg9[%c0_167, %c0_168] : memref<8x32xf32, #tpu.memory_space<vmem>>, vector<8x32xf32>
      tpu.vector_store %arg9[%c0_167, %c0_168], %293 {strides = array<i32>} : memref<8x32xf32, #tpu.memory_space<vmem>>, vector<8x32xf32>,
      %cst_169 = arith.constant 0.000000e+00 : f32
      %295 = vector.broadcast %cst_169 : f32 to vector<8x32xf32>
      %c0_170 = arith.constant 0 : index
      %c0_171 = arith.constant 0 : index
      %296 = vector.load %arg10[%c0_170, %c0_171] : memref<8x32xf32, #tpu.memory_space<vmem>>, vector<8x32xf32>
      tpu.vector_store %arg10[%c0_170, %c0_171], %295 {strides = array<i32>} : memref<8x32xf32, #tpu.memory_space<vmem>>, vector<8x32xf32>,
    } else {
    }
    %c0 = arith.constant 0 : index
    %c0_1 = arith.constant 0 : index
    %3 = vector.load %arg3[%c0, %c0_1] : memref<32x128xf32, #tpu.memory_space<vmem>>, vector<32x128xf32>
    %c0_2 = arith.constant 0 : index
    %c0_3 = arith.constant 0 : index
    %4 = vector.load %arg4[%c0_2, %c0_3] : memref<32x128xf32, #tpu.memory_space<vmem>>, vector<32x128xf32>
    %c0_i32_4 = arith.constant 0 : i32
    %c3_i32 = arith.constant 3 : i32
    %5 = arith.subi %c3_i32, %c0_i32_4 : i32
    %6 = arith.index_cast %c0_i32_4 : i32 to index
    %c0_5 = arith.constant 0 : index
    %c0_6 = arith.constant 0 : index
    %7 = vector.load %arg1[%6, %c0_5, %c0_6] : memref<4x8x128xf32, #tpu.memory_space<vmem>>, vector<1x8x128xf32>
    %8 = vector.shape_cast %7 : vector<1x8x128xf32> to vector<8x128xf32>
    %c0_7 = arith.constant 0 : index
    %c0_8 = arith.constant 0 : index
    %9 = vector.load %arg7[%c0_7, %c0_8] : memref<8x32xf32, #tpu.memory_space<vmem>>, vector<8x32xf32>
    %c0_9 = arith.constant 0 : index
    %c0_10 = arith.constant 0 : index
    %10 = vector.load %arg8[%c0_9, %c0_10] : memref<8x32xf32, #tpu.memory_space<vmem>>, vector<8x32xf32>
    %cst = arith.constant dense<0.000000e+00> : vector<8x128xf32>
    %11 = tpu.matmul %9, %3, %cst {dimension_numbers = #tpu.dot_dimension_numbers<[1], [0], [0], [1], [0, 0, 1, 1], [], []>} : vector<8x32xf32>, vector<32x128xf32>, vector<8x128xf32> -> vector<8x128xf32>
    %12 = arith.addf %8, %11 : vector<8x128xf32>
    %13 = math.tanh %12 : vector<8x128xf32>
    %14 = vector.extract_strided_slice %13 {offsets = [0, 0], sizes = [8, 32], strides = [1, 1]} : vector<8x128xf32> to vector<8x32xf32>
    %cst_11 = arith.constant 1.000000e+00 : f32
    %15 = vector.broadcast %cst_11 : f32 to vector<8x32xf32>
    %16 = arith.addf %14, %15 : vector<8x32xf32>
    %cst_12 = arith.constant 5.000000e-01 : f32
    %17 = vector.broadcast %cst_12 : f32 to vector<8x32xf32>
    %18 = arith.mulf %17, %16 : vector<8x32xf32>
    %19 = vector.extract_strided_slice %13 {offsets = [0, 32], sizes = [8, 32], strides = [1, 1]} : vector<8x128xf32> to vector<8x32xf32>
    %cst_13 = arith.constant 1.000000e+00 : f32
    %20 = vector.broadcast %cst_13 : f32 to vector<8x32xf32>
    %21 = arith.addf %19, %20 : vector<8x32xf32>
    %cst_14 = arith.constant 5.000000e-01 : f32
    %22 = vector.broadcast %cst_14 : f32 to vector<8x32xf32>
    %23 = arith.mulf %22, %21 : vector<8x32xf32>
    %24 = vector.extract_strided_slice %13 {offsets = [0, 64], sizes = [8, 32], strides = [1, 1]} : vector<8x128xf32> to vector<8x32xf32>
    %25 = vector.extract_strided_slice %13 {offsets = [0, 96], sizes = [8, 32], strides = [1, 1]} : vector<8x128xf32> to vector<8x32xf32>
    %cst_15 = arith.constant 1.000000e+00 : f32
    %26 = vector.broadcast %cst_15 : f32 to vector<8x32xf32>
    %27 = arith.addf %25, %26 : vector<8x32xf32>
    %cst_16 = arith.constant 5.000000e-01 : f32
    %28 = vector.broadcast %cst_16 : f32 to vector<8x32xf32>
    %29 = arith.mulf %28, %27 : vector<8x32xf32>
    %30 = arith.mulf %23, %10 : vector<8x32xf32>
    %31 = arith.mulf %18, %24 : vector<8x32xf32>
    %32 = arith.addf %30, %31 : vector<8x32xf32>
    %33 = math.tanh %32 : vector<8x32xf32>
    %34 = arith.mulf %29, %33 : vector<8x32xf32>
    %35 = arith.index_cast %5 : i32 to index
    %c0_17 = arith.constant 0 : index
    %c0_18 = arith.constant 0 : index
    %36 = vector.load %arg2[%35, %c0_17, %c0_18] : memref<4x8x128xf32, #tpu.memory_space<vmem>>, vector<1x8x128xf32>
    %37 = vector.shape_cast %36 : vector<1x8x128xf32> to vector<8x128xf32>
    %c0_19 = arith.constant 0 : index
    %c0_20 = arith.constant 0 : index
    %38 = vector.load %arg9[%c0_19, %c0_20] : memref<8x32xf32, #tpu.memory_space<vmem>>, vector<8x32xf32>
    %c0_21 = arith.constant 0 : index
    %c0_22 = arith.constant 0 : index
    %39 = vector.load %arg10[%c0_21, %c0_22] : memref<8x32xf32, #tpu.memory_space<vmem>>, vector<8x32xf32>
    %cst_23 = arith.constant dense<0.000000e+00> : vector<8x128xf32>
    %40 = tpu.matmul %38, %4, %cst_23 {dimension_numbers = #tpu.dot_dimension_numbers<[1], [0], [0], [1], [0, 0, 1, 1], [], []>} : vector<8x32xf32>, vector<32x128xf32>, vector<8x128xf32> -> vector<8x128xf32>
    %41 = arith.addf %37, %40 : vector<8x128xf32>
    %42 = math.tanh %41 : vector<8x128xf32>
    %43 = vector.extract_strided_slice %42 {offsets = [0, 0], sizes = [8, 32], strides = [1, 1]} : vector<8x128xf32> to vector<8x32xf32>
    %cst_24 = arith.constant 1.000000e+00 : f32
    %44 = vector.broadcast %cst_24 : f32 to vector<8x32xf32>
    %45 = arith.addf %43, %44 : vector<8x32xf32>
    %cst_25 = arith.constant 5.000000e-01 : f32
    %46 = vector.broadcast %cst_25 : f32 to vector<8x32xf32>
    %47 = arith.mulf %46, %45 : vector<8x32xf32>
    %48 = vector.extract_strided_slice %42 {offsets = [0, 32], sizes = [8, 32], strides = [1, 1]} : vector<8x128xf32> to vector<8x32xf32>
    %cst_26 = arith.constant 1.000000e+00 : f32
    %49 = vector.broadcast %cst_26 : f32 to vector<8x32xf32>
    %50 = arith.addf %48, %49 : vector<8x32xf32>
    %cst_27 = arith.constant 5.000000e-01 : f32
    %51 = vector.broadcast %cst_27 : f32 to vector<8x32xf32>
    %52 = arith.mulf %51, %50 : vector<8x32xf32>
    %53 = vector.extract_strided_slice %42 {offsets = [0, 64], sizes = [8, 32], strides = [1, 1]} : vector<8x128xf32> to vector<8x32xf32>
    %54 = vector.extract_strided_slice %42 {offsets = [0, 96], sizes = [8, 32], strides = [1, 1]} : vector<8x128xf32> to vector<8x32xf32>
    %cst_28 = arith.constant 1.000000e+00 : f32
    %55 = vector.broadcast %cst_28 : f32 to vector<8x32xf32>
    %56 = arith.addf %54, %55 : vector<8x32xf32>
    %cst_29 = arith.constant 5.000000e-01 : f32
    %57 = vector.broadcast %cst_29 : f32 to vector<8x32xf32>
    %58 = arith.mulf %57, %56 : vector<8x32xf32>
    %59 = arith.mulf %52, %39 : vector<8x32xf32>
    %60 = arith.mulf %47, %53 : vector<8x32xf32>
    %61 = arith.addf %59, %60 : vector<8x32xf32>
    %62 = math.tanh %61 : vector<8x32xf32>
    %63 = arith.mulf %58, %62 : vector<8x32xf32>
    %c0_30 = arith.constant 0 : index
    %c0_31 = arith.constant 0 : index
    %64 = vector.load %arg7[%c0_30, %c0_31] : memref<8x32xf32, #tpu.memory_space<vmem>>, vector<8x32xf32>
    tpu.vector_store %arg7[%c0_30, %c0_31], %34 {strides = array<i32>} : memref<8x32xf32, #tpu.memory_space<vmem>>, vector<8x32xf32>,
    %c0_32 = arith.constant 0 : index
    %c0_33 = arith.constant 0 : index
    %65 = vector.load %arg8[%c0_32, %c0_33] : memref<8x32xf32, #tpu.memory_space<vmem>>, vector<8x32xf32>
    tpu.vector_store %arg8[%c0_32, %c0_33], %32 {strides = array<i32>} : memref<8x32xf32, #tpu.memory_space<vmem>>, vector<8x32xf32>,
    %c0_34 = arith.constant 0 : index
    %c0_35 = arith.constant 0 : index
    %66 = vector.load %arg9[%c0_34, %c0_35] : memref<8x32xf32, #tpu.memory_space<vmem>>, vector<8x32xf32>
    tpu.vector_store %arg9[%c0_34, %c0_35], %63 {strides = array<i32>} : memref<8x32xf32, #tpu.memory_space<vmem>>, vector<8x32xf32>,
    %c0_36 = arith.constant 0 : index
    %c0_37 = arith.constant 0 : index
    %67 = vector.load %arg10[%c0_36, %c0_37] : memref<8x32xf32, #tpu.memory_space<vmem>>, vector<8x32xf32>
    tpu.vector_store %arg10[%c0_36, %c0_37], %61 {strides = array<i32>} : memref<8x32xf32, #tpu.memory_space<vmem>>, vector<8x32xf32>,
    %68 = arith.index_cast %c0_i32_4 : i32 to index
    %c0_38 = arith.constant 0 : index
    %c0_39 = arith.constant 0 : index
    %69 = vector.load %arg5[%68, %c0_38, %c0_39] : memref<4x8x32xf32, #tpu.memory_space<vmem>>, vector<1x8x32xf32>
    %70 = vector.shape_cast %69 : vector<1x8x32xf32> to vector<8x32xf32>
    %71 = vector.shape_cast %34 : vector<8x32xf32> to vector<1x8x32xf32>
    tpu.vector_store %arg5[%68, %c0_38, %c0_39], %71 {strides = array<i32>} : memref<4x8x32xf32, #tpu.memory_space<vmem>>, vector<1x8x32xf32>,
    %72 = arith.index_cast %5 : i32 to index
    %c0_40 = arith.constant 0 : index
    %c0_41 = arith.constant 0 : index
    %73 = vector.load %arg6[%72, %c0_40, %c0_41] : memref<4x8x32xf32, #tpu.memory_space<vmem>>, vector<1x8x32xf32>
    %74 = vector.shape_cast %73 : vector<1x8x32xf32> to vector<8x32xf32>
    %75 = vector.shape_cast %63 : vector<8x32xf32> to vector<1x8x32xf32>
    tpu.vector_store %arg6[%72, %c0_40, %c0_41], %75 {strides = array<i32>} : memref<4x8x32xf32, #tpu.memory_space<vmem>>, vector<1x8x32xf32>,
    %c1_i32 = arith.constant 1 : i32
    %c3_i32_42 = arith.constant 3 : i32
    %76 = arith.subi %c3_i32_42, %c1_i32 : i32
    %77 = arith.index_cast %c1_i32 : i32 to index
    %c0_43 = arith.constant 0 : index
    %c0_44 = arith.constant 0 : index
    %78 = vector.load %arg1[%77, %c0_43, %c0_44] : memref<4x8x128xf32, #tpu.memory_space<vmem>>, vector<1x8x128xf32>
    %79 = vector.shape_cast %78 : vector<1x8x128xf32> to vector<8x128xf32>
    %c0_45 = arith.constant 0 : index
    %c0_46 = arith.constant 0 : index
    %80 = vector.load %arg7[%c0_45, %c0_46] : memref<8x32xf32, #tpu.memory_space<vmem>>, vector<8x32xf32>
    %c0_47 = arith.constant 0 : index
    %c0_48 = arith.constant 0 : index
    %81 = vector.load %arg8[%c0_47, %c0_48] : memref<8x32xf32, #tpu.memory_space<vmem>>, vector<8x32xf32>
    %cst_49 = arith.constant dense<0.000000e+00> : vector<8x128xf32>
    %82 = tpu.matmul %80, %3, %cst_49 {dimension_numbers = #tpu.dot_dimension_numbers<[1], [0], [0], [1], [0, 0, 1, 1], [], []>} : vector<8x32xf32>, vector<32x128xf32>, vector<8x128xf32> -> vector<8x128xf32>
    %83 = arith.addf %79, %82 : vector<8x128xf32>
    %84 = math.tanh %83 : vector<8x128xf32>
    %85 = vector.extract_strided_slice %84 {offsets = [0, 0], sizes = [8, 32], strides = [1, 1]} : vector<8x128xf32> to vector<8x32xf32>
    %cst_50 = arith.constant 1.000000e+00 : f32
    %86 = vector.broadcast %cst_50 : f32 to vector<8x32xf32>
    %87 = arith.addf %85, %86 : vector<8x32xf32>
    %cst_51 = arith.constant 5.000000e-01 : f32
    %88 = vector.broadcast %cst_51 : f32 to vector<8x32xf32>
    %89 = arith.mulf %88, %87 : vector<8x32xf32>
    %90 = vector.extract_strided_slice %84 {offsets = [0, 32], sizes = [8, 32], strides = [1, 1]} : vector<8x128xf32> to vector<8x32xf32>
    %cst_52 = arith.constant 1.000000e+00 : f32
    %91 = vector.broadcast %cst_52 : f32 to vector<8x32xf32>
    %92 = arith.addf %90, %91 : vector<8x32xf32>
    %cst_53 = arith.constant 5.000000e-01 : f32
    %93 = vector.broadcast %cst_53 : f32 to vector<8x32xf32>
    %94 = arith.mulf %93, %92 : vector<8x32xf32>
    %95 = vector.extract_strided_slice %84 {offsets = [0, 64], sizes = [8, 32], strides = [1, 1]} : vector<8x128xf32> to vector<8x32xf32>
    %96 = vector.extract_strided_slice %84 {offsets = [0, 96], sizes = [8, 32], strides = [1, 1]} : vector<8x128xf32> to vector<8x32xf32>
    %cst_54 = arith.constant 1.000000e+00 : f32
    %97 = vector.broadcast %cst_54 : f32 to vector<8x32xf32>
    %98 = arith.addf %96, %97 : vector<8x32xf32>
    %cst_55 = arith.constant 5.000000e-01 : f32
    %99 = vector.broadcast %cst_55 : f32 to vector<8x32xf32>
    %100 = arith.mulf %99, %98 : vector<8x32xf32>
    %101 = arith.mulf %94, %81 : vector<8x32xf32>
    %102 = arith.mulf %89, %95 : vector<8x32xf32>
    %103 = arith.addf %101, %102 : vector<8x32xf32>
    %104 = math.tanh %103 : vector<8x32xf32>
    %105 = arith.mulf %100, %104 : vector<8x32xf32>
    %106 = arith.index_cast %76 : i32 to index
    %c0_56 = arith.constant 0 : index
    %c0_57 = arith.constant 0 : index
    %107 = vector.load %arg2[%106, %c0_56, %c0_57] : memref<4x8x128xf32, #tpu.memory_space<vmem>>, vector<1x8x128xf32>
    %108 = vector.shape_cast %107 : vector<1x8x128xf32> to vector<8x128xf32>
    %c0_58 = arith.constant 0 : index
    %c0_59 = arith.constant 0 : index
    %109 = vector.load %arg9[%c0_58, %c0_59] : memref<8x32xf32, #tpu.memory_space<vmem>>, vector<8x32xf32>
    %c0_60 = arith.constant 0 : index
    %c0_61 = arith.constant 0 : index
    %110 = vector.load %arg10[%c0_60, %c0_61] : memref<8x32xf32, #tpu.memory_space<vmem>>, vector<8x32xf32>
    %cst_62 = arith.constant dense<0.000000e+00> : vector<8x128xf32>
    %111 = tpu.matmul %109, %4, %cst_62 {dimension_numbers = #tpu.dot_dimension_numbers<[1], [0], [0], [1], [0, 0, 1, 1], [], []>} : vector<8x32xf32>, vector<32x128xf32>, vector<8x128xf32> -> vector<8x128xf32>
    %112 = arith.addf %108, %111 : vector<8x128xf32>
    %113 = math.tanh %112 : vector<8x128xf32>
    %114 = vector.extract_strided_slice %113 {offsets = [0, 0], sizes = [8, 32], strides = [1, 1]} : vector<8x128xf32> to vector<8x32xf32>
    %cst_63 = arith.constant 1.000000e+00 : f32
    %115 = vector.broadcast %cst_63 : f32 to vector<8x32xf32>
    %116 = arith.addf %114, %115 : vector<8x32xf32>
    %cst_64 = arith.constant 5.000000e-01 : f32
    %117 = vector.broadcast %cst_64 : f32 to vector<8x32xf32>
    %118 = arith.mulf %117, %116 : vector<8x32xf32>
    %119 = vector.extract_strided_slice %113 {offsets = [0, 32], sizes = [8, 32], strides = [1, 1]} : vector<8x128xf32> to vector<8x32xf32>
    %cst_65 = arith.constant 1.000000e+00 : f32
    %120 = vector.broadcast %cst_65 : f32 to vector<8x32xf32>
    %121 = arith.addf %119, %120 : vector<8x32xf32>
    %cst_66 = arith.constant 5.000000e-01 : f32
    %122 = vector.broadcast %cst_66 : f32 to vector<8x32xf32>
    %123 = arith.mulf %122, %121 : vector<8x32xf32>
    %124 = vector.extract_strided_slice %113 {offsets = [0, 64], sizes = [8, 32], strides = [1, 1]} : vector<8x128xf32> to vector<8x32xf32>
    %125 = vector.extract_strided_slice %113 {offsets = [0, 96], sizes = [8, 32], strides = [1, 1]} : vector<8x128xf32> to vector<8x32xf32>
    %cst_67 = arith.constant 1.000000e+00 : f32
    %126 = vector.broadcast %cst_67 : f32 to vector<8x32xf32>
    %127 = arith.addf %125, %126 : vector<8x32xf32>
    %cst_68 = arith.constant 5.000000e-01 : f32
    %128 = vector.broadcast %cst_68 : f32 to vector<8x32xf32>
    %129 = arith.mulf %128, %127 : vector<8x32xf32>
    %130 = arith.mulf %123, %110 : vector<8x32xf32>
    %131 = arith.mulf %118, %124 : vector<8x32xf32>
    %132 = arith.addf %130, %131 : vector<8x32xf32>
    %133 = math.tanh %132 : vector<8x32xf32>
    %134 = arith.mulf %129, %133 : vector<8x32xf32>
    %c0_69 = arith.constant 0 : index
    %c0_70 = arith.constant 0 : index
    %135 = vector.load %arg7[%c0_69, %c0_70] : memref<8x32xf32, #tpu.memory_space<vmem>>, vector<8x32xf32>
    tpu.vector_store %arg7[%c0_69, %c0_70], %105 {strides = array<i32>} : memref<8x32xf32, #tpu.memory_space<vmem>>, vector<8x32xf32>,
    %c0_71 = arith.constant 0 : index
    %c0_72 = arith.constant 0 : index
    %136 = vector.load %arg8[%c0_71, %c0_72] : memref<8x32xf32, #tpu.memory_space<vmem>>, vector<8x32xf32>
    tpu.vector_store %arg8[%c0_71, %c0_72], %103 {strides = array<i32>} : memref<8x32xf32, #tpu.memory_space<vmem>>, vector<8x32xf32>,
    %c0_73 = arith.constant 0 : index
    %c0_74 = arith.constant 0 : index
    %137 = vector.load %arg9[%c0_73, %c0_74] : memref<8x32xf32, #tpu.memory_space<vmem>>, vector<8x32xf32>
    tpu.vector_store %arg9[%c0_73, %c0_74], %134 {strides = array<i32>} : memref<8x32xf32, #tpu.memory_space<vmem>>, vector<8x32xf32>,
    %c0_75 = arith.constant 0 : index
    %c0_76 = arith.constant 0 : index
    %138 = vector.load %arg10[%c0_75, %c0_76] : memref<8x32xf32, #tpu.memory_space<vmem>>, vector<8x32xf32>
    tpu.vector_store %arg10[%c0_75, %c0_76], %132 {strides = array<i32>} : memref<8x32xf32, #tpu.memory_space<vmem>>, vector<8x32xf32>,
    %139 = arith.index_cast %c1_i32 : i32 to index
    %c0_77 = arith.constant 0 : index
    %c0_78 = arith.constant 0 : index
    %140 = vector.load %arg5[%139, %c0_77, %c0_78] : memref<4x8x32xf32, #tpu.memory_space<vmem>>, vector<1x8x32xf32>
    %141 = vector.shape_cast %140 : vector<1x8x32xf32> to vector<8x32xf32>
    %142 = vector.shape_cast %105 : vector<8x32xf32> to vector<1x8x32xf32>
    tpu.vector_store %arg5[%139, %c0_77, %c0_78], %142 {strides = array<i32>} : memref<4x8x32xf32, #tpu.memory_space<vmem>>, vector<1x8x32xf32>,
    %143 = arith.index_cast %76 : i32 to index
    %c0_79 = arith.constant 0 : index
    %c0_80 = arith.constant 0 : index
    %144 = vector.load %arg6[%143, %c0_79, %c0_80] : memref<4x8x32xf32, #tpu.memory_space<vmem>>, vector<1x8x32xf32>
    %145 = vector.shape_cast %144 : vector<1x8x32xf32> to vector<8x32xf32>
    %146 = vector.shape_cast %134 : vector<8x32xf32> to vector<1x8x32xf32>
    tpu.vector_store %arg6[%143, %c0_79, %c0_80], %146 {strides = array<i32>} : memref<4x8x32xf32, #tpu.memory_space<vmem>>, vector<1x8x32xf32>,
    %c2_i32 = arith.constant 2 : i32
    %c3_i32_81 = arith.constant 3 : i32
    %147 = arith.subi %c3_i32_81, %c2_i32 : i32
    %148 = arith.index_cast %c2_i32 : i32 to index
    %c0_82 = arith.constant 0 : index
    %c0_83 = arith.constant 0 : index
    %149 = vector.load %arg1[%148, %c0_82, %c0_83] : memref<4x8x128xf32, #tpu.memory_space<vmem>>, vector<1x8x128xf32>
    %150 = vector.shape_cast %149 : vector<1x8x128xf32> to vector<8x128xf32>
    %c0_84 = arith.constant 0 : index
    %c0_85 = arith.constant 0 : index
    %151 = vector.load %arg7[%c0_84, %c0_85] : memref<8x32xf32, #tpu.memory_space<vmem>>, vector<8x32xf32>
    %c0_86 = arith.constant 0 : index
    %c0_87 = arith.constant 0 : index
    %152 = vector.load %arg8[%c0_86, %c0_87] : memref<8x32xf32, #tpu.memory_space<vmem>>, vector<8x32xf32>
    %cst_88 = arith.constant dense<0.000000e+00> : vector<8x128xf32>
    %153 = tpu.matmul %151, %3, %cst_88 {dimension_numbers = #tpu.dot_dimension_numbers<[1], [0], [0], [1], [0, 0, 1, 1], [], []>} : vector<8x32xf32>, vector<32x128xf32>, vector<8x128xf32> -> vector<8x128xf32>
    %154 = arith.addf %150, %153 : vector<8x128xf32>
    %155 = math.tanh %154 : vector<8x128xf32>
    %156 = vector.extract_strided_slice %155 {offsets = [0, 0], sizes = [8, 32], strides = [1, 1]} : vector<8x128xf32> to vector<8x32xf32>
    %cst_89 = arith.constant 1.000000e+00 : f32
    %157 = vector.broadcast %cst_89 : f32 to vector<8x32xf32>
    %158 = arith.addf %156, %157 : vector<8x32xf32>
    %cst_90 = arith.constant 5.000000e-01 : f32
    %159 = vector.broadcast %cst_90 : f32 to vector<8x32xf32>
    %160 = arith.mulf %159, %158 : vector<8x32xf32>
    %161 = vector.extract_strided_slice %155 {offsets = [0, 32], sizes = [8, 32], strides = [1, 1]} : vector<8x128xf32> to vector<8x32xf32>
    %cst_91 = arith.constant 1.000000e+00 : f32
    %162 = vector.broadcast %cst_91 : f32 to vector<8x32xf32>
    %163 = arith.addf %161, %162 : vector<8x32xf32>
    %cst_92 = arith.constant 5.000000e-01 : f32
    %164 = vector.broadcast %cst_92 : f32 to vector<8x32xf32>
    %165 = arith.mulf %164, %163 : vector<8x32xf32>
    %166 = vector.extract_strided_slice %155 {offsets = [0, 64], sizes = [8, 32], strides = [1, 1]} : vector<8x128xf32> to vector<8x32xf32>
    %167 = vector.extract_strided_slice %155 {offsets = [0, 96], sizes = [8, 32], strides = [1, 1]} : vector<8x128xf32> to vector<8x32xf32>
    %cst_93 = arith.constant 1.000000e+00 : f32
    %168 = vector.broadcast %cst_93 : f32 to vector<8x32xf32>
    %169 = arith.addf %167, %168 : vector<8x32xf32>
    %cst_94 = arith.constant 5.000000e-01 : f32
    %170 = vector.broadcast %cst_94 : f32 to vector<8x32xf32>
    %171 = arith.mulf %170, %169 : vector<8x32xf32>
    %172 = arith.mulf %165, %152 : vector<8x32xf32>
    %173 = arith.mulf %160, %166 : vector<8x32xf32>
    %174 = arith.addf %172, %173 : vector<8x32xf32>
    %175 = math.tanh %174 : vector<8x32xf32>
    %176 = arith.mulf %171, %175 : vector<8x32xf32>
    %177 = arith.index_cast %147 : i32 to index
    %c0_95 = arith.constant 0 : index
    %c0_96 = arith.constant 0 : index
    %178 = vector.load %arg2[%177, %c0_95, %c0_96] : memref<4x8x128xf32, #tpu.memory_space<vmem>>, vector<1x8x128xf32>
    %179 = vector.shape_cast %178 : vector<1x8x128xf32> to vector<8x128xf32>
    %c0_97 = arith.constant 0 : index
    %c0_98 = arith.constant 0 : index
    %180 = vector.load %arg9[%c0_97, %c0_98] : memref<8x32xf32, #tpu.memory_space<vmem>>, vector<8x32xf32>
    %c0_99 = arith.constant 0 : index
    %c0_100 = arith.constant 0 : index
    %181 = vector.load %arg10[%c0_99, %c0_100] : memref<8x32xf32, #tpu.memory_space<vmem>>, vector<8x32xf32>
    %cst_101 = arith.constant dense<0.000000e+00> : vector<8x128xf32>
    %182 = tpu.matmul %180, %4, %cst_101 {dimension_numbers = #tpu.dot_dimension_numbers<[1], [0], [0], [1], [0, 0, 1, 1], [], []>} : vector<8x32xf32>, vector<32x128xf32>, vector<8x128xf32> -> vector<8x128xf32>
    %183 = arith.addf %179, %182 : vector<8x128xf32>
    %184 = math.tanh %183 : vector<8x128xf32>
    %185 = vector.extract_strided_slice %184 {offsets = [0, 0], sizes = [8, 32], strides = [1, 1]} : vector<8x128xf32> to vector<8x32xf32>
    %cst_102 = arith.constant 1.000000e+00 : f32
    %186 = vector.broadcast %cst_102 : f32 to vector<8x32xf32>
    %187 = arith.addf %185, %186 : vector<8x32xf32>
    %cst_103 = arith.constant 5.000000e-01 : f32
    %188 = vector.broadcast %cst_103 : f32 to vector<8x32xf32>
    %189 = arith.mulf %188, %187 : vector<8x32xf32>
    %190 = vector.extract_strided_slice %184 {offsets = [0, 32], sizes = [8, 32], strides = [1, 1]} : vector<8x128xf32> to vector<8x32xf32>
    %cst_104 = arith.constant 1.000000e+00 : f32
    %191 = vector.broadcast %cst_104 : f32 to vector<8x32xf32>
    %192 = arith.addf %190, %191 : vector<8x32xf32>
    %cst_105 = arith.constant 5.000000e-01 : f32
    %193 = vector.broadcast %cst_105 : f32 to vector<8x32xf32>
    %194 = arith.mulf %193, %192 : vector<8x32xf32>
    %195 = vector.extract_strided_slice %184 {offsets = [0, 64], sizes = [8, 32], strides = [1, 1]} : vector<8x128xf32> to vector<8x32xf32>
    %196 = vector.extract_strided_slice %184 {offsets = [0, 96], sizes = [8, 32], strides = [1, 1]} : vector<8x128xf32> to vector<8x32xf32>
    %cst_106 = arith.constant 1.000000e+00 : f32
    %197 = vector.broadcast %cst_106 : f32 to vector<8x32xf32>
    %198 = arith.addf %196, %197 : vector<8x32xf32>
    %cst_107 = arith.constant 5.000000e-01 : f32
    %199 = vector.broadcast %cst_107 : f32 to vector<8x32xf32>
    %200 = arith.mulf %199, %198 : vector<8x32xf32>
    %201 = arith.mulf %194, %181 : vector<8x32xf32>
    %202 = arith.mulf %189, %195 : vector<8x32xf32>
    %203 = arith.addf %201, %202 : vector<8x32xf32>
    %204 = math.tanh %203 : vector<8x32xf32>
    %205 = arith.mulf %200, %204 : vector<8x32xf32>
    %c0_108 = arith.constant 0 : index
    %c0_109 = arith.constant 0 : index
    %206 = vector.load %arg7[%c0_108, %c0_109] : memref<8x32xf32, #tpu.memory_space<vmem>>, vector<8x32xf32>
    tpu.vector_store %arg7[%c0_108, %c0_109], %176 {strides = array<i32>} : memref<8x32xf32, #tpu.memory_space<vmem>>, vector<8x32xf32>,
    %c0_110 = arith.constant 0 : index
    %c0_111 = arith.constant 0 : index
    %207 = vector.load %arg8[%c0_110, %c0_111] : memref<8x32xf32, #tpu.memory_space<vmem>>, vector<8x32xf32>
    tpu.vector_store %arg8[%c0_110, %c0_111], %174 {strides = array<i32>} : memref<8x32xf32, #tpu.memory_space<vmem>>, vector<8x32xf32>,
    %c0_112 = arith.constant 0 : index
    %c0_113 = arith.constant 0 : index
    %208 = vector.load %arg9[%c0_112, %c0_113] : memref<8x32xf32, #tpu.memory_space<vmem>>, vector<8x32xf32>
    tpu.vector_store %arg9[%c0_112, %c0_113], %205 {strides = array<i32>} : memref<8x32xf32, #tpu.memory_space<vmem>>, vector<8x32xf32>,
    %c0_114 = arith.constant 0 : index
    %c0_115 = arith.constant 0 : index
    %209 = vector.load %arg10[%c0_114, %c0_115] : memref<8x32xf32, #tpu.memory_space<vmem>>, vector<8x32xf32>
    tpu.vector_store %arg10[%c0_114, %c0_115], %203 {strides = array<i32>} : memref<8x32xf32, #tpu.memory_space<vmem>>, vector<8x32xf32>,
    %210 = arith.index_cast %c2_i32 : i32 to index
    %c0_116 = arith.constant 0 : index
    %c0_117 = arith.constant 0 : index
    %211 = vector.load %arg5[%210, %c0_116, %c0_117] : memref<4x8x32xf32, #tpu.memory_space<vmem>>, vector<1x8x32xf32>
    %212 = vector.shape_cast %211 : vector<1x8x32xf32> to vector<8x32xf32>
    %213 = vector.shape_cast %176 : vector<8x32xf32> to vector<1x8x32xf32>
    tpu.vector_store %arg5[%210, %c0_116, %c0_117], %213 {strides = array<i32>} : memref<4x8x32xf32, #tpu.memory_space<vmem>>, vector<1x8x32xf32>,
    %214 = arith.index_cast %147 : i32 to index
    %c0_118 = arith.constant 0 : index
    %c0_119 = arith.constant 0 : index
    %215 = vector.load %arg6[%214, %c0_118, %c0_119] : memref<4x8x32xf32, #tpu.memory_space<vmem>>, vector<1x8x32xf32>
    %216 = vector.shape_cast %215 : vector<1x8x32xf32> to vector<8x32xf32>
    %217 = vector.shape_cast %205 : vector<8x32xf32> to vector<1x8x32xf32>
    tpu.vector_store %arg6[%214, %c0_118, %c0_119], %217 {strides = array<i32>} : memref<4x8x32xf32, #tpu.memory_space<vmem>>, vector<1x8x32xf32>,
    %c3_i32_120 = arith.constant 3 : i32
    %c3_i32_121 = arith.constant 3 : i32
    %218 = arith.subi %c3_i32_121, %c3_i32_120 : i32
    %219 = arith.index_cast %c3_i32_120 : i32 to index
    %c0_122 = arith.constant 0 : index
    %c0_123 = arith.constant 0 : index
    %220 = vector.load %arg1[%219, %c0_122, %c0_123] : memref<4x8x128xf32, #tpu.memory_space<vmem>>, vector<1x8x128xf32>
    %221 = vector.shape_cast %220 : vector<1x8x128xf32> to vector<8x128xf32>
    %c0_124 = arith.constant 0 : index
    %c0_125 = arith.constant 0 : index
    %222 = vector.load %arg7[%c0_124, %c0_125] : memref<8x32xf32, #tpu.memory_space<vmem>>, vector<8x32xf32>
    %c0_126 = arith.constant 0 : index
    %c0_127 = arith.constant 0 : index
    %223 = vector.load %arg8[%c0_126, %c0_127] : memref<8x32xf32, #tpu.memory_space<vmem>>, vector<8x32xf32>
    %cst_128 = arith.constant dense<0.000000e+00> : vector<8x128xf32>
    %224 = tpu.matmul %222, %3, %cst_128 {dimension_numbers = #tpu.dot_dimension_numbers<[1], [0], [0], [1], [0, 0, 1, 1], [], []>} : vector<8x32xf32>, vector<32x128xf32>, vector<8x128xf32> -> vector<8x128xf32>
    %225 = arith.addf %221, %224 : vector<8x128xf32>
    %226 = math.tanh %225 : vector<8x128xf32>
    %227 = vector.extract_strided_slice %226 {offsets = [0, 0], sizes = [8, 32], strides = [1, 1]} : vector<8x128xf32> to vector<8x32xf32>
    %cst_129 = arith.constant 1.000000e+00 : f32
    %228 = vector.broadcast %cst_129 : f32 to vector<8x32xf32>
    %229 = arith.addf %227, %228 : vector<8x32xf32>
    %cst_130 = arith.constant 5.000000e-01 : f32
    %230 = vector.broadcast %cst_130 : f32 to vector<8x32xf32>
    %231 = arith.mulf %230, %229 : vector<8x32xf32>
    %232 = vector.extract_strided_slice %226 {offsets = [0, 32], sizes = [8, 32], strides = [1, 1]} : vector<8x128xf32> to vector<8x32xf32>
    %cst_131 = arith.constant 1.000000e+00 : f32
    %233 = vector.broadcast %cst_131 : f32 to vector<8x32xf32>
    %234 = arith.addf %232, %233 : vector<8x32xf32>
    %cst_132 = arith.constant 5.000000e-01 : f32
    %235 = vector.broadcast %cst_132 : f32 to vector<8x32xf32>
    %236 = arith.mulf %235, %234 : vector<8x32xf32>
    %237 = vector.extract_strided_slice %226 {offsets = [0, 64], sizes = [8, 32], strides = [1, 1]} : vector<8x128xf32> to vector<8x32xf32>
    %238 = vector.extract_strided_slice %226 {offsets = [0, 96], sizes = [8, 32], strides = [1, 1]} : vector<8x128xf32> to vector<8x32xf32>
    %cst_133 = arith.constant 1.000000e+00 : f32
    %239 = vector.broadcast %cst_133 : f32 to vector<8x32xf32>
    %240 = arith.addf %238, %239 : vector<8x32xf32>
    %cst_134 = arith.constant 5.000000e-01 : f32
    %241 = vector.broadcast %cst_134 : f32 to vector<8x32xf32>
    %242 = arith.mulf %241, %240 : vector<8x32xf32>
    %243 = arith.mulf %236, %223 : vector<8x32xf32>
    %244 = arith.mulf %231, %237 : vector<8x32xf32>
    %245 = arith.addf %243, %244 : vector<8x32xf32>
    %246 = math.tanh %245 : vector<8x32xf32>
    %247 = arith.mulf %242, %246 : vector<8x32xf32>
    %248 = arith.index_cast %218 : i32 to index
    %c0_135 = arith.constant 0 : index
    %c0_136 = arith.constant 0 : index
    %249 = vector.load %arg2[%248, %c0_135, %c0_136] : memref<4x8x128xf32, #tpu.memory_space<vmem>>, vector<1x8x128xf32>
    %250 = vector.shape_cast %249 : vector<1x8x128xf32> to vector<8x128xf32>
    %c0_137 = arith.constant 0 : index
    %c0_138 = arith.constant 0 : index
    %251 = vector.load %arg9[%c0_137, %c0_138] : memref<8x32xf32, #tpu.memory_space<vmem>>, vector<8x32xf32>
    %c0_139 = arith.constant 0 : index
    %c0_140 = arith.constant 0 : index
    %252 = vector.load %arg10[%c0_139, %c0_140] : memref<8x32xf32, #tpu.memory_space<vmem>>, vector<8x32xf32>
    %cst_141 = arith.constant dense<0.000000e+00> : vector<8x128xf32>
    %253 = tpu.matmul %251, %4, %cst_141 {dimension_numbers = #tpu.dot_dimension_numbers<[1], [0], [0], [1], [0, 0, 1, 1], [], []>} : vector<8x32xf32>, vector<32x128xf32>, vector<8x128xf32> -> vector<8x128xf32>
    %254 = arith.addf %250, %253 : vector<8x128xf32>
    %255 = math.tanh %254 : vector<8x128xf32>
    %256 = vector.extract_strided_slice %255 {offsets = [0, 0], sizes = [8, 32], strides = [1, 1]} : vector<8x128xf32> to vector<8x32xf32>
    %cst_142 = arith.constant 1.000000e+00 : f32
    %257 = vector.broadcast %cst_142 : f32 to vector<8x32xf32>
    %258 = arith.addf %256, %257 : vector<8x32xf32>
    %cst_143 = arith.constant 5.000000e-01 : f32
    %259 = vector.broadcast %cst_143 : f32 to vector<8x32xf32>
    %260 = arith.mulf %259, %258 : vector<8x32xf32>
    %261 = vector.extract_strided_slice %255 {offsets = [0, 32], sizes = [8, 32], strides = [1, 1]} : vector<8x128xf32> to vector<8x32xf32>
    %cst_144 = arith.constant 1.000000e+00 : f32
    %262 = vector.broadcast %cst_144 : f32 to vector<8x32xf32>
    %263 = arith.addf %261, %262 : vector<8x32xf32>
    %cst_145 = arith.constant 5.000000e-01 : f32
    %264 = vector.broadcast %cst_145 : f32 to vector<8x32xf32>
    %265 = arith.mulf %264, %263 : vector<8x32xf32>
    %266 = vector.extract_strided_slice %255 {offsets = [0, 64], sizes = [8, 32], strides = [1, 1]} : vector<8x128xf32> to vector<8x32xf32>
    %267 = vector.extract_strided_slice %255 {offsets = [0, 96], sizes = [8, 32], strides = [1, 1]} : vector<8x128xf32> to vector<8x32xf32>
    %cst_146 = arith.constant 1.000000e+00 : f32
    %268 = vector.broadcast %cst_146 : f32 to vector<8x32xf32>
    %269 = arith.addf %267, %268 : vector<8x32xf32>
    %cst_147 = arith.constant 5.000000e-01 : f32
    %270 = vector.broadcast %cst_147 : f32 to vector<8x32xf32>
    %271 = arith.mulf %270, %269 : vector<8x32xf32>
    %272 = arith.mulf %265, %252 : vector<8x32xf32>
    %273 = arith.mulf %260, %266 : vector<8x32xf32>
    %274 = arith.addf %272, %273 : vector<8x32xf32>
    %275 = math.tanh %274 : vector<8x32xf32>
    %276 = arith.mulf %271, %275 : vector<8x32xf32>
    %c0_148 = arith.constant 0 : index
    %c0_149 = arith.constant 0 : index
    %277 = vector.load %arg7[%c0_148, %c0_149] : memref<8x32xf32, #tpu.memory_space<vmem>>, vector<8x32xf32>
    tpu.vector_store %arg7[%c0_148, %c0_149], %247 {strides = array<i32>} : memref<8x32xf32, #tpu.memory_space<vmem>>, vector<8x32xf32>,
    %c0_150 = arith.constant 0 : index
    %c0_151 = arith.constant 0 : index
    %278 = vector.load %arg8[%c0_150, %c0_151] : memref<8x32xf32, #tpu.memory_space<vmem>>, vector<8x32xf32>
    tpu.vector_store %arg8[%c0_150, %c0_151], %245 {strides = array<i32>} : memref<8x32xf32, #tpu.memory_space<vmem>>, vector<8x32xf32>,
    %c0_152 = arith.constant 0 : index
    %c0_153 = arith.constant 0 : index
    %279 = vector.load %arg9[%c0_152, %c0_153] : memref<8x32xf32, #tpu.memory_space<vmem>>, vector<8x32xf32>
    tpu.vector_store %arg9[%c0_152, %c0_153], %276 {strides = array<i32>} : memref<8x32xf32, #tpu.memory_space<vmem>>, vector<8x32xf32>,
    %c0_154 = arith.constant 0 : index
    %c0_155 = arith.constant 0 : index
    %280 = vector.load %arg10[%c0_154, %c0_155] : memref<8x32xf32, #tpu.memory_space<vmem>>, vector<8x32xf32>
    tpu.vector_store %arg10[%c0_154, %c0_155], %274 {strides = array<i32>} : memref<8x32xf32, #tpu.memory_space<vmem>>, vector<8x32xf32>,
    %281 = arith.index_cast %c3_i32_120 : i32 to index
    %c0_156 = arith.constant 0 : index
    %c0_157 = arith.constant 0 : index
    %282 = vector.load %arg5[%281, %c0_156, %c0_157] : memref<4x8x32xf32, #tpu.memory_space<vmem>>, vector<1x8x32xf32>
    %283 = vector.shape_cast %282 : vector<1x8x32xf32> to vector<8x32xf32>
    %284 = vector.shape_cast %247 : vector<8x32xf32> to vector<1x8x32xf32>
    tpu.vector_store %arg5[%281, %c0_156, %c0_157], %284 {strides = array<i32>} : memref<4x8x32xf32, #tpu.memory_space<vmem>>, vector<1x8x32xf32>,
    %285 = arith.index_cast %218 : i32 to index
    %c0_158 = arith.constant 0 : index
    %c0_159 = arith.constant 0 : index
    %286 = vector.load %arg6[%285, %c0_158, %c0_159] : memref<4x8x32xf32, #tpu.memory_space<vmem>>, vector<1x8x32xf32>
    %287 = vector.shape_cast %286 : vector<1x8x32xf32> to vector<8x32xf32>
    %288 = vector.shape_cast %276 : vector<8x32xf32> to vector<1x8x32xf32>
    tpu.vector_store %arg6[%285, %c0_158, %c0_159], %288 {strides = array<i32>} : memref<4x8x32xf32, #tpu.memory_space<vmem>>, vector<1x8x32xf32>,
    %c4_i32 = arith.constant 4 : i32
    return
  }
  func.func @transform_0(%arg0: i32) -> (i32, i32, i32) {
    %c0_i32 = arith.constant 0 : i32
    %c0_i32_0 = arith.constant 0 : i32
    %c0_i32_1 = arith.constant 0 : i32
    return %arg0, %c0_i32, %c0_i32_0 : i32, i32, i32
  }
  func.func @transform_1(%arg0: i32) -> (i32, i32, i32) {
    %c1_i32 = arith.constant 1 : i32
    %0 = arith.subi %c1_i32, %arg0 : i32
    %c0_i32 = arith.constant 0 : i32
    %c0_i32_0 = arith.constant 0 : i32
    %c0_i32_1 = arith.constant 0 : i32
    return %0, %c0_i32, %c0_i32_0 : i32, i32, i32
  }
  func.func @transform_2(%arg0: i32) -> (i32, i32) {
    %c0_i32 = arith.constant 0 : i32
    %c0_i32_0 = arith.constant 0 : i32
    %c0_i32_1 = arith.constant 0 : i32
    return %c0_i32, %c0_i32_0 : i32, i32
  }
  func.func @transform_3(%arg0: i32) -> (i32, i32) {
    %c0_i32 = arith.constant 0 : i32
    %c0_i32_0 = arith.constant 0 : i32
    %c0_i32_1 = arith.constant 0 : i32
    return %c0_i32, %c0_i32_0 : i32, i32
  }
  func.func @transform_4(%arg0: i32) -> (i32, i32, i32) {
    %c0_i32 = arith.constant 0 : i32
    %c0_i32_0 = arith.constant 0 : i32
    %c0_i32_1 = arith.constant 0 : i32
    return %arg0, %c0_i32, %c0_i32_0 : i32, i32, i32
  }
  func.func @transform_5(%arg0: i32) -> (i32, i32, i32) {
    %c1_i32 = arith.constant 1 : i32
    %0 = arith.subi %c1_i32, %arg0 : i32
    %c0_i32 = arith.constant 0 : i32
    %c0_i32_0 = arith.constant 0 : i32
    %c0_i32_1 = arith.constant 0 : i32
    return %0, %c0_i32, %c0_i32_0 : i32, i32, i32
  }
}

</mosaic_0001>

<bundles_post_ra>
// kernel: brnn_forward.1
= control target key start
LH: loop header
LB: loop body
LE: loop exit
PB: predicated region body
PF: predicated region fallthrough
CT: control target
= control target key end

     0   :  { %s1611_s18 = smov 0   ;;  %s1818_s0 = inlined_call_operand.vmem [shape: f32[8,8,128], index: 0, kind: input, shape index: {}]   ;;  %s1819_s1 = inlined_call_operand.vmem [shape: f32[8,8,128], index: 1, kind: input, shape index: {}]   ;;  %s1820_s2 = inlined_call_operand.vmem [shape: f32[32,128], index: 2, kind: input, shape index: {}]   ;;  %s1821_s3 = inlined_call_operand.vmem [shape: f32[32,128], index: 3, kind: input, shape index: {}]   ;;  %s1822_s4 = inlined_call_operand.vmem [shape: f32[8,8,32], index: 4, kind: output, shape index: {0}]   ;;  %s1823_s5 = inlined_call_operand.vmem [shape: f32[8,8,32], index: 5, kind: output, shape index: {1}]  }
   0x1 LB: > { %s1307_s19 = sadd.s32 4294967295, %s1572_s18   ;;  %p1311_p0 = scmp.ge.s32.totalorder %s1572_s18, 1  ;;  %s1572_s18 = sphi %s1611_s18, %s16_s18  }
   0x2   : > { %p208_p1 = scmp.lt.s32.totalorder %s1572_s18, 3 }
   0x4   : > { %p209_p2 = pnand %p1311_p0, %p208_p1 }
   0x5   : > { %s1312_s20 = sshll.u32 (!%p209_p2), %s1307_s19, 2  ;;  %s254_s21 = ssub.s32 (!%p209_p2), 1, %s1307_s19 }
   0x6   : > { %212 = sbr.rel (%p209_p2) target bundleno = 2871 (0xb37), region = 36  ;;  %p249_p3 = scmp.lt.s32.totalorder (!%p209_p2), %s1312_s20, 7 }
   0x7   : > { %s1314_s22 = sshll.u32 (!%p209_p2), %s254_s21, 2  ;;  %p1320_p5 = scmp.ne.s32.totalorder (!%p209_p2), %s1307_s19, 0 }
   0x8   : > { %p256_p4 = scmp.lt.s32.totalorder (!%p209_p2), %s1314_s22, 7 }
   0xd   : > { %s1825_s20 = smov (!%p249_p3, %s1312_s20), 7  ;;  %s1827_s22 = smov (!%p256_p4, %s1314_s22), 7 }
   0xe   : > { %s1313_s23 = sshll.u32 %s1825_s20, 3  ;;  %s1315_s27 = sshll.u32 %s1827_s22, 3  ;;  %vm280_vm0 = vcmask (!%p1320_p5), 261120   ;;  %v1574_v0 = vmov (!%p1320_p5), 0.0  }
   0xf   : > { %s1622_s26 = scalar_lea.vmem %s1818_s0, %s1313_s23  ;;  %s1627_s30 = scalar_lea.vmem %s1819_s1, %s1315_s27  ;;  %281 = vst.msk [vmem:[#allocation2] sm:$0xff] (!%p1320_p5), %vm280_vm0, %v1574_v0  ;;  %282 = vst.msk [vmem:[#allocation3] sm:$0xff] (!%p1320_p5), %vm280_vm0, %v1574_v0 }
  0x10   : > { %s1632_s8 = scalar_lea.vmem %s1822_s4, %s1313_s23  ;;  %s1637_s11 = scalar_lea.vmem %s1823_s5, %s1315_s27  ;;  %283 = vst.msk [vmem:[#allocation4] sm:$0xff] (!%p1320_p5), %vm280_vm0, %v1574_v0  ;;  %284 = vst.msk [vmem:[#allocation5] sm:$0xff] (!%p1320_p5), %vm280_vm0, %v1574_v0 }
  0x11   : > { %279 = sbr.rel (%p1320_p5) target bundleno = 24 (0x18), region = 40 }
  0x18 PF: > { %v285_v1 = vld [vmem:[%s1820_s2] sm:$0xff]  ;;  %v286_v2 = vld [vmem:[%s1820_s2 + $0x8] sm:$0xff]  ;;  %v1575_v4 = vmov 0.0|0.0   ;;  %v287_v7 = vld [vmem:[%s1820_s2 + $0x10] sm:$0xff]  ;;  %vm1576_vm1 = vmmov 0   ;;  %v1577_v10 = vmov 0.0  }
  0x19   : > { %v289_v3 = vld [vmem:[%s1821_s3] sm:$0xff]  ;;  %1471 = vmatprep.subr.bf16.mxu0 %v1575_v4  ;;  %v1649_v5 = vpack.c.bf16 %v286_v2, %v285_v1  ;;  %1477 = vmatprep.subr.bf16.mxu1 %v1575_v4  ;;  %v290_v6 = vld [vmem:[%s1821_s3 + $0x8] sm:$0xff]  ;;  %v288_v8 = vld [vmem:[%s1820_s2 + $0x18] sm:$0xff]  ;;  %s1578_s6 = smov 32   ;;  %vm296_vm2 = vcmask 261120   ;;  %s1579_s7 = smov 64  }
  0x1a   : > { %v1661_v9 = vpack.c.bf16 %v290_v6, %v289_v3  ;;  %1391 = vmatprep.mubr.msk.f32.mxu0 %vm1576_vm1, %v1577_v10  ;;  %v291_v11 = vld [vmem:[%s1821_s3 + $0x10] sm:$0xff]  ;;  %v292_v12 = vld [vmem:[%s1821_s3 + $0x18] sm:$0xff]  ;;  %1402 = vmatprep.mubr.msk.f32.mxu1 %vm1576_vm1, %v1577_v10  ;;  %v1674_v13 = vpack.c.bf16 %v288_v8, %v287_v7  ;;  %v295_v14 = vld [vmem:[#allocation3] sm:$0xff]  ;;  %s1580_s9 = smov 96  }
  0x1b   : > { %1473 = vmatpush3.bf16.msra.mxu0 %v1649_v5  ;;  %v1678_v15 = vpack.c.bf16 %v292_v12, %v291_v11  ;;  %375 = vrot.lane.b32.xlu1 %v295_v14, %s1578_s6  ;;  %v398_v16 = vld [vmem:[#allocation5] sm:$0xff]  ;;  %v294_v17 = vld [vmem:[#allocation2] sm:$0xff]  ;;  %v397_v18 = vld [vmem:[#allocation4] sm:$0xff] }
  0x1c   : > { %1474 = vmatprep.subr.bf16.mxu0 %v1575_v4  ;;  %1479 = vmatpush3.bf16.msra.mxu1 %v1661_v9  ;;  %v293_v19 = vld [vmem:[%s1622_s26] sm:$0xff]  ;;  %v1322_v20 = vld [vmem:[%s1627_s30 + $0x18] sm:$0xff]  ;;  %v1325_v57 = vld [vmem:[%s1622_s26 + $0x8] sm:$0xff] }
  0x1d   : > { %1480 = vmatprep.subr.bf16.mxu1 %v1575_v4  ;;  %v1327_v61 = vld [vmem:[%s1627_s30 + $0x10] sm:$0xff] }
  0x1f   : > { %1476 = vmatpush3.bf16.msra.mxu0 %v1674_v13  ;;  %477 = vrot.lane.b32.xlu1 %v398_v16, %s1578_s6 }
  0x20   : > { %1482 = vmatpush3.bf16.msra.mxu1 %v1678_v15  ;;  %1483 = vmatprep.subr.bf16.mxu0 %v1575_v4 }
  0x21   : > { %1489 = vmatprep.subr.bf16.mxu1 %v1575_v4 }
  0x22   : > { %1392 = vmatmul.mubr.msk.f32.vlgmr.msra.gmra.mrb[0].mxu0 %vm296_vm2, %v294_v17 }
  0x23   : > { %1403 = vmatmul.mubr.msk.f32.vlgmr.msra.gmra.mrb[0].mxu1 %vm296_vm2, %v397_v18  ;;  %1485 = vmatpush3.bf16.msra.mxu0 %v1649_v5 }
  0x24   : > { %1486 = vmatprep.subr.bf16.mxu0 %v1575_v4  ;;  %1491 = vmatpush3.bf16.msra.mxu1 %v1661_v9 }
  0x25   : > { %1413 = vmatprep.mubr.msk.f32.mxu0 %vm1576_vm1, %v1577_v10  ;;  %1492 = vmatprep.subr.bf16.mxu1 %v1575_v4 }
  0x26   : > { %1424 = vmatprep.mubr.msk.f32.mxu1 %vm1576_vm1, %v1577_v10 }
  0x27   : > { %1488 = vmatpush3.bf16.msra.mxu0 %v1674_v13 }
  0x28   : > { %1494 = vmatpush3.bf16.msra.mxu1 %v1678_v15  ;;  %1495 = vmatprep.subr.bf16.mxu0 %v1575_v4 }
  0x29   : > { %1501 = vmatprep.subr.bf16.mxu1 %v1575_v4 }
  0x8d   : > { %v376_v37 = vpop.permute.xlu1 %375 }
  0x91   : > { %v478_v39 = vpop.permute.xlu1 %477 }
  0xf5   : > { %v366_v21 = vpop.f32.mrb[0].mxu0 }
  0xf6   : > { %v370_v22 = vadd.f32 %v366_v21, %v293_v19  ;;  %v1393_v23 = vpop.f32.mrb[1].mxu0  ;;  %v468_v24 = vpop.f32.mrb[0].mxu1 }
  0xf7   : > { %v472_v25 = vadd.f32 %v1322_v20, %v468_v24  ;;  %v1404_v26 = vpop.f32.mrb[1].mxu1 }
  0xf8   : > { %1534 = vtanh.f32 %v370_v22 }
  0xf9   : > { %1536 = vtanh.f32 %v472_v25 }
 0x102   : > { %v1535_v27 = vpop.eup %1534 }
 0x103   : > { %380 = vrot.lane.b32.xlu0 %v1535_v27, %s1579_s7  ;;  %v1537_v28 = vpop.eup %1536  ;;  %v372_v29 = vadd.f32 1.0, %v1535_v27 }
 0x104   : > { %v474_v31 = vadd.f32 1.0, %v1537_v28 }
 0x105   : > { %v373_v30 = vmul.f32 0.5, %v372_v29 }
 0x106   : > { %v475_v34 = vmul.f32 0.5, %v474_v31 }
 0x107   : > { %482 = vrot.lane.b32.xlu0 %v1537_v28, %s1579_s7  ;;  %v378_v38 = vmul.f32 %v376_v37, %v373_v30 }
 0x108   : > { %v480_v42 = vmul.f32 %v478_v39, %v475_v34 }
 0x175   : > { %v381_v32 = vpop.permute.xlu0 %380 }
 0x176   : > { %v383_v33 = vmul.f32 %v381_v32, %v373_v30 }
 0x178   : > { %385 = vrot.lane.b32.xlu0 %v383_v33, %s1578_s6 }
 0x179   : > { %v483_v35 = vpop.permute.xlu0 %482 }
 0x17a   : > { %v485_v36 = vmul.f32 %v483_v35, %v475_v34 }
 0x17c   : > { %487 = vrot.lane.b32.xlu1 %v485_v36, %s1578_s6 }
 0x1ea   : > { %v386_v40 = vpop.permute.xlu0 %385 }
 0x1eb   : > { %v388_v41 = vadd.f32 %v386_v40, %v378_v38 }
 0x1ed   : > { %1538 = vtanh.f32 %v388_v41 }
 0x1ee   : > { %v488_v43 = vpop.permute.xlu1 %487 }
 0x1ef   : > { %v490_v44 = vadd.f32 %v488_v43, %v480_v42  ;;  %v1333_v42 = vld [vmem:[%s1627_s30 + $0x8] sm:$0xff] }
 0x1f1   : > { %1540 = vtanh.f32 %v490_v44 }
 0x1f7   : > { %v1539_v45 = vpop.eup %1538 }
 0x1f8   : > { %391 = vrot.lane.b32.xlu0 %v1539_v45, %s1579_s7 }
 0x1fb   : > { %v1541_v46 = vpop.eup %1540 }
 0x1fc   : > { %493 = vrot.lane.b32.xlu1 %v1541_v46, %s1579_s7 }
 0x26a   : > { %v392_v47 = vpop.permute.xlu0 %391 }
 0x26b   : > { %v394_v48 = vmul.f32 %v392_v47, %v373_v30 }
 0x26d   : > { %498 = vrot.lane.b32.xlu0 %v394_v48, %s1578_s6 }
 0x26e   : > { %v494_v49 = vpop.permute.xlu1 %493 }
 0x26f   : > { %v496_v50 = vmul.f32 %v494_v49, %v475_v34 }
 0x271   : > { %508 = vrot.lane.b32.xlu1 %v496_v50, %s1578_s6  ;;  %503 = vrot.lane.b32.xlu0 %v388_v41, %s1580_s9 }
 0x275   : > { %513 = vrot.lane.b32.xlu1 %v490_v44, %s1580_s9 }
 0x2df   : > { %v499_v51 = vpop.permute.xlu0 %498 }
 0x2e0   : > { %501 = vst.msk [vmem:[#allocation2] sm:$0xff] %vm296_vm2, %v499_v51  ;;  %517 = vst.msk [vmem:[%s1632_s8] sm:$0xff] %vm296_vm2, %v499_v51 }
 0x2e3   : > { %v509_v52 = vpop.permute.xlu1 %508  ;;  %v504_v53 = vpop.permute.xlu0 %503 }
 0x2e4   : > { %511 = vst.msk [vmem:[#allocation4] sm:$0xff] %vm296_vm2, %v509_v52  ;;  %1324 = vst.msk [vmem:[%s1637_s11 + $0x18] sm:$0xff] %vm296_vm2, %v509_v52 }
 0x2e5   : > { %506 = vst.msk [vmem:[#allocation3] sm:$0xff] %vm296_vm2, %v504_v53 }
 0x2e7   : > { %v514_v54 = vpop.permute.xlu1 %513  ;;  %v522_v55 = vld [vmem:[#allocation2] sm:$0xff] }
 0x2e8   : > { %516 = vst.msk [vmem:[#allocation5] sm:$0xff] %vm296_vm2, %v514_v54  ;;  %1414 = vmatmul.mubr.msk.f32.vlgmr.msra.gmra.mrb[2].mxu0 %vm296_vm2, %v522_v55 }
 0x2e9   : > { %1497 = vmatpush3.bf16.msra.mxu0 %v1649_v5  ;;  %1435 = vmatprep.mubr.msk.f32.mxu0 %vm1576_vm1, %v1577_v10 }
 0x2ea   : > { %1498 = vmatprep.subr.bf16.mxu0 %v1575_v4 }
 0x2eb   : > { %v624_v56 = vld [vmem:[#allocation4] sm:$0xff] }
 0x2ec   : > { %1425 = vmatmul.mubr.msk.f32.vlgmr.msra.gmra.mrb[2].mxu1 %vm296_vm2, %v624_v56  ;;  %v523_v3 = vld [vmem:[#allocation3] sm:$0xff] }
 0x2ed   : > { %1500 = vmatpush3.bf16.msra.mxu0 %v1674_v13  ;;  %1503 = vmatpush3.bf16.msra.mxu1 %v1661_v9 }
 0x2ee   : > { %1504 = vmatprep.subr.bf16.mxu1 %v1575_v4  ;;  %1446 = vmatprep.mubr.msk.f32.mxu1 %vm1576_vm1, %v1577_v10 }
 0x2ef   : > { %1507 = vmatprep.subr.bf16.mxu0 %v1575_v4  ;;  %v625_v6 = vld [vmem:[#allocation5] sm:$0xff] }
 0x2f1   : > { %1506 = vmatpush3.bf16.msra.mxu1 %v1678_v15 }
 0x2f2   : > { %1513 = vmatprep.subr.bf16.mxu1 %v1575_v4 }
 0x3bb   : > { %v593_v58 = vpop.f32.mrb[2].mxu0 }
 0x3bc   : > { %v597_v59 = vadd.f32 %v1325_v57, %v593_v58  ;;  %v1415_v60 = vpop.f32.mrb[3].mxu0 }
 0x3be   : > { %1542 = vtanh.f32 %v597_v59 }
 0x3bf   : > { %v695_v62 = vpop.f32.mrb[2].mxu1 }
 0x3c0   : > { %v699_v63 = vadd.f32 %v1327_v61, %v695_v62  ;;  %v1426_v0 = vpop.f32.mrb[3].mxu1 }
 0x3c2   : > { %1544 = vtanh.f32 %v699_v63 }
 0x3c8   : > { %v1543_v1 = vpop.eup %1542 }
 0x3c9   : > { %607 = vrot.lane.b32.xlu0 %v1543_v1, %s1579_s7  ;;  %v599_v7 = vadd.f32 1.0, %v1543_v1 }
 0x3cb   : > { %v600_v8 = vmul.f32 0.5, %v599_v7 }
 0x3cc   : > { %v1545_v2 = vpop.eup %1544 }
 0x3cd   : > { %709 = vrot.lane.b32.xlu1 %v1545_v2, %s1579_s7  ;;  %602 = vrot.lane.b32.xlu0 %v523_v3, %s1578_s6  ;;  %v701_v11 = vadd.f32 1.0, %v1545_v2 }
 0x3cf   : > { %v702_v16 = vmul.f32 0.5, %v701_v11 }
 0x3d1   : > { %704 = vrot.lane.b32.xlu1 %v625_v6, %s1578_s6 }
 0x43b   : > { %v608_v12 = vpop.permute.xlu0 %607 }
 0x43c   : > { %v610_v14 = vmul.f32 %v608_v12, %v600_v8 }
 0x43e   : > { %612 = vrot.lane.b32.xlu0 %v610_v14, %s1578_s6  ;;  %v1337_v14 = vld [vmem:[%s1622_s26 + $0x18] sm:$0xff] }
 0x43f   : > { %v710_v17 = vpop.permute.xlu1 %709  ;;  %v603_v19 = vpop.permute.xlu0 %602 }
 0x440   : > { %v712_v18 = vmul.f32 %v710_v17, %v702_v16  ;;  %v605_v20 = vmul.f32 %v603_v19, %v600_v8  ;;  %v1078_v19 = vld [vmem:[%s1627_s30] sm:$0xff] }
 0x442   : > { %714 = vrot.lane.b32.xlu1 %v712_v18, %s1578_s6 }
 0x443   : > { %v705_v21 = vpop.permute.xlu1 %704 }
 0x444   : > { %v707_v24 = vmul.f32 %v705_v21, %v702_v16 }
 0x4b0   : > { %v613_v22 = vpop.permute.xlu0 %612 }
 0x4b1   : > { %v615_v23 = vadd.f32 %v613_v22, %v605_v20 }
 0x4b3   : > { %1546 = vtanh.f32 %v615_v23 }
 0x4b4   : > { %v715_v25 = vpop.permute.xlu1 %714 }
 0x4b5   : > { %v717_v26 = vadd.f32 %v715_v25, %v707_v24 }
 0x4b7   : > { %1548 = vtanh.f32 %v717_v26 }
 0x4bd   : > { %v1547_v27 = vpop.eup %1546 }
 0x4be   : > { %618 = vrot.lane.b32.xlu0 %v1547_v27, %s1579_s7 }
 0x4c1   : > { %v1549_v28 = vpop.eup %1548 }
 0x4c2   : > { %720 = vrot.lane.b32.xlu1 %v1549_v28, %s1579_s7 }
 0x530   : > { %v619_v29 = vpop.permute.xlu0 %618 }
 0x531   : > { %v621_v30 = vmul.f32 %v619_v29, %v600_v8 }
 0x533   : > { %725 = vrot.lane.b32.xlu0 %v621_v30, %s1578_s6 }
 0x534   : > { %v721_v31 = vpop.permute.xlu1 %720 }
 0x535   : > { %v723_v32 = vmul.f32 %v721_v31, %v702_v16 }
 0x537   : > { %735 = vrot.lane.b32.xlu1 %v723_v32, %s1578_s6  ;;  %730 = vrot.lane.b32.xlu0 %v615_v23, %s1580_s9 }
 0x53b   : > { %740 = vrot.lane.b32.xlu1 %v717_v26, %s1580_s9 }
 0x5a5   : > { %v726_v33 = vpop.permute.xlu0 %725 }
 0x5a6   : > { %728 = vst.msk [vmem:[#allocation2] sm:$0xff] %vm296_vm2, %v726_v33  ;;  %1329 = vst.msk [vmem:[%s1632_s8 + $0x8] sm:$0xff] %vm296_vm2, %v726_v33 }
 0x5a9   : > { %v736_v34 = vpop.permute.xlu1 %735  ;;  %v731_v35 = vpop.permute.xlu0 %730 }
 0x5aa   : > { %738 = vst.msk [vmem:[#allocation4] sm:$0xff] %vm296_vm2, %v736_v34  ;;  %1330 = vst.msk [vmem:[%s1637_s11 + $0x10] sm:$0xff] %vm296_vm2, %v736_v34 }
 0x5ab   : > { %733 = vst.msk [vmem:[#allocation3] sm:$0xff] %vm296_vm2, %v731_v35 }
 0x5ad   : > { %v741_v36 = vpop.permute.xlu1 %740  ;;  %v750_v37 = vld [vmem:[#allocation2] sm:$0xff] }
 0x5ae   : > { %743 = vst.msk [vmem:[#allocation5] sm:$0xff] %vm296_vm2, %v741_v36  ;;  %1436 = vmatmul.mubr.msk.f32.vlgmr.msra.gmra.mrb[4].mxu0 %vm296_vm2, %v750_v37 }
 0x5af   : > { %1509 = vmatpush3.bf16.msra.mxu0 %v1649_v5  ;;  %1457 = vmatprep.mubr.msk.f32.mxu0 %vm1576_vm1, %v1577_v10  ;;  %v1331_v5 = vld [vmem:[%s1622_s26 + $0x10] sm:$0xff] }
 0x5b0   : > { %1510 = vmatprep.subr.bf16.mxu0 %v1575_v4 }
 0x5b1   : > { %v852_v38 = vld [vmem:[#allocation4] sm:$0xff] }
 0x5b2   : > { %1447 = vmatmul.mubr.msk.f32.vlgmr.msra.gmra.mrb[4].mxu1 %vm296_vm2, %v852_v38 }
 0x5b3   : > { %1512 = vmatpush3.bf16.msra.mxu0 %v1674_v13  ;;  %1515 = vmatpush3.bf16.msra.mxu1 %v1661_v9 }
 0x5b4   : > { %1516 = vmatprep.subr.bf16.mxu1 %v1575_v4  ;;  %1468 = vmatprep.mubr.msk.f32.mxu1 %vm1576_vm1, %v1577_v10  ;;  %v751_v4 = vld [vmem:[#allocation3] sm:$0xff] }
 0x5b5   : > { %v853_v10 = vld [vmem:[#allocation5] sm:$0xff] }
 0x5b7   : > { %1518 = vmatpush3.bf16.msra.mxu1 %v1678_v15 }
 0x681   : > { %v821_v39 = vpop.f32.mrb[4].mxu0 }
 0x682   : > { %v825_v40 = vadd.f32 %v1331_v5, %v821_v39  ;;  %v1437_v41 = vpop.f32.mrb[5].mxu0 }
 0x684   : > { %1550 = vtanh.f32 %v825_v40 }
 0x685   : > { %v923_v43 = vpop.f32.mrb[4].mxu1 }
 0x686   : > { %v927_v44 = vadd.f32 %v1333_v42, %v923_v43  ;;  %v1448_v45 = vpop.f32.mrb[5].mxu1 }
 0x688   : > { %1552 = vtanh.f32 %v927_v44 }
 0x68e   : > { %v1551_v13 = vpop.eup %1550 }
 0x68f   : > { %835 = vrot.lane.b32.xlu0 %v1551_v13, %s1579_s7  ;;  %v827_v15 = vadd.f32 1.0, %v1551_v13 }
 0x691   : > { %v828_v46 = vmul.f32 0.5, %v827_v15 }
 0x692   : > { %v1553_v9 = vpop.eup %1552 }
 0x693   : > { %937 = vrot.lane.b32.xlu1 %v1553_v9, %s1579_s7  ;;  %830 = vrot.lane.b32.xlu0 %v751_v4, %s1578_s6  ;;  %v929_v47 = vadd.f32 1.0, %v1553_v9 }
 0x695   : > { %v930_v50 = vmul.f32 0.5, %v929_v47 }
 0x697   : > { %932 = vrot.lane.b32.xlu1 %v853_v10, %s1578_s6 }
 0x701   : > { %v836_v48 = vpop.permute.xlu0 %835 }
 0x702   : > { %v838_v49 = vmul.f32 %v836_v48, %v828_v46 }
 0x704   : > { %840 = vrot.lane.b32.xlu0 %v838_v49, %s1578_s6 }
 0x705   : > { %v938_v51 = vpop.permute.xlu1 %937  ;;  %v831_v53 = vpop.permute.xlu0 %830 }
 0x706   : > { %v940_v52 = vmul.f32 %v938_v51, %v930_v50  ;;  %v833_v54 = vmul.f32 %v831_v53, %v828_v46 }
 0x708   : > { %942 = vrot.lane.b32.xlu1 %v940_v52, %s1578_s6 }
 0x709   : > { %v933_v55 = vpop.permute.xlu1 %932 }
 0x70a   : > { %v935_v58 = vmul.f32 %v933_v55, %v930_v50 }
 0x776   : > { %v841_v56 = vpop.permute.xlu0 %840 }
 0x777   : > { %v843_v57 = vadd.f32 %v841_v56, %v833_v54 }
 0x779   : > { %1554 = vtanh.f32 %v843_v57 }
 0x77a   : > { %v943_v59 = vpop.permute.xlu1 %942 }
 0x77b   : > { %v945_v60 = vadd.f32 %v943_v59, %v935_v58 }
 0x77d   : > { %1556 = vtanh.f32 %v945_v60 }
 0x783   : > { %v1555_v61 = vpop.eup %1554 }
 0x784   : > { %846 = vrot.lane.b32.xlu0 %v1555_v61, %s1579_s7 }
 0x787   : > { %v1557_v62 = vpop.eup %1556 }
 0x788   : > { %948 = vrot.lane.b32.xlu1 %v1557_v62, %s1579_s7 }
 0x7f6   : > { %v847_v63 = vpop.permute.xlu0 %846 }
 0x7f7   : > { %v849_v0 = vmul.f32 %v847_v63, %v828_v46 }
 0x7f9   : > { %953 = vrot.lane.b32.xlu0 %v849_v0, %s1578_s6 }
 0x7fa   : > { %v949_v1 = vpop.permute.xlu1 %948 }
 0x7fb   : > { %v951_v2 = vmul.f32 %v949_v1, %v930_v50 }
 0x7fd   : > { %963 = vrot.lane.b32.xlu1 %v951_v2, %s1578_s6  ;;  %958 = vrot.lane.b32.xlu0 %v843_v57, %s1580_s9 }
 0x801   : > { %968 = vrot.lane.b32.xlu1 %v945_v60, %s1580_s9 }
 0x86b   : > { %v954_v3 = vpop.permute.xlu0 %953 }
 0x86c   : > { %956 = vst.msk [vmem:[#allocation2] sm:$0xff] %vm296_vm2, %v954_v3  ;;  %1335 = vst.msk [vmem:[%s1632_s8 + $0x10] sm:$0xff] %vm296_vm2, %v954_v3 }
 0x86f   : > { %v964_v6 = vpop.permute.xlu1 %963  ;;  %v959_v7 = vpop.permute.xlu0 %958 }
 0x870   : > { %966 = vst.msk [vmem:[#allocation4] sm:$0xff] %vm296_vm2, %v964_v6  ;;  %1336 = vst.msk [vmem:[%s1637_s11 + $0x8] sm:$0xff] %vm296_vm2, %v964_v6 }
 0x871   : > { %961 = vst.msk [vmem:[#allocation3] sm:$0xff] %vm296_vm2, %v959_v7 }
 0x873   : > { %v969_v8 = vpop.permute.xlu1 %968  ;;  %v978_v11 = vld [vmem:[#allocation2] sm:$0xff] }
 0x874   : > { %971 = vst.msk [vmem:[#allocation5] sm:$0xff] %vm296_vm2, %v969_v8  ;;  %1458 = vmatmul.mubr.msk.f32.vlgmr.msra.gmra.mrb[6].mxu0 %vm296_vm2, %v978_v11 }
 0x877   : > { %v1079_v12 = vld [vmem:[#allocation4] sm:$0xff] }
 0x878   : > { %1469 = vmatmul.mubr.msk.f32.vlgmr.msra.gmra.mrb[6].mxu1 %vm296_vm2, %v1079_v12  ;;  %v979_v25 = vld [vmem:[#allocation3] sm:$0xff] }
 0x87b   : > { %v1080_v26 = vld [vmem:[#allocation5] sm:$0xff] }
 0x947   : > { %v1049_v16 = vpop.f32.mrb[6].mxu0 }
 0x948   : > { %v1053_v17 = vadd.f32 %v1337_v14, %v1049_v16  ;;  %v1459_v18 = vpop.f32.mrb[7].mxu0 }
 0x94a   : > { %1558 = vtanh.f32 %v1053_v17 }
 0x94b   : > { %v1150_v20 = vpop.f32.mrb[6].mxu1 }
 0x94c   : > { %v1154_v21 = vadd.f32 %v1150_v20, %v1078_v19  ;;  %v1470_v22 = vpop.f32.mrb[7].mxu1 }
 0x94e   : > { %1560 = vtanh.f32 %v1154_v21 }
 0x954   : > { %v1559_v23 = vpop.eup %1558 }
 0x955   : > { %1063 = vrot.lane.b32.xlu0 %v1559_v23, %s1579_s7  ;;  %v1055_v27 = vadd.f32 1.0, %v1559_v23 }
 0x957   : > { %v1056_v28 = vmul.f32 0.5, %v1055_v27 }
 0x958   : > { %v1561_v24 = vpop.eup %1560 }
 0x959   : > { %1164 = vrot.lane.b32.xlu1 %v1561_v24, %s1579_s7  ;;  %1058 = vrot.lane.b32.xlu0 %v979_v25, %s1578_s6  ;;  %v1156_v29 = vadd.f32 1.0, %v1561_v24 }
 0x95b   : > { %v1157_v32 = vmul.f32 0.5, %v1156_v29 }
 0x95d   : > { %1159 = vrot.lane.b32.xlu1 %v1080_v26, %s1578_s6 }
 0x9c7   : > { %v1064_v30 = vpop.permute.xlu0 %1063 }
 0x9c8   : > { %v1066_v31 = vmul.f32 %v1064_v30, %v1056_v28 }
 0x9ca   : > { %1068 = vrot.lane.b32.xlu0 %v1066_v31, %s1578_s6 }
 0x9cb   : > { %v1165_v33 = vpop.permute.xlu1 %1164  ;;  %v1059_v35 = vpop.permute.xlu0 %1058 }
 0x9cc   : > { %v1167_v34 = vmul.f32 %v1165_v33, %v1157_v32  ;;  %v1061_v36 = vmul.f32 %v1059_v35, %v1056_v28 }
 0x9ce   : > { %1169 = vrot.lane.b32.xlu1 %v1167_v34, %s1578_s6 }
 0x9cf   : > { %v1160_v37 = vpop.permute.xlu1 %1159 }
 0x9d0   : > { %v1162_v39 = vmul.f32 %v1160_v37, %v1157_v32 }
 0xa3c   : > { %v1069_v38 = vpop.permute.xlu0 %1068 }
 0xa3d   : > { %v1071_v5 = vadd.f32 %v1069_v38, %v1061_v36 }
 0xa3f   : > { %1562 = vtanh.f32 %v1071_v5 }
 0xa40   : > { %v1170_v40 = vpop.permute.xlu1 %1169 }
 0xa41   : > { %v1172_v41 = vadd.f32 %v1170_v40, %v1162_v39 }
 0xa43   : > { %1564 = vtanh.f32 %v1172_v41 }
 0xa49   : > { %v1563_v42 = vpop.eup %1562 }
 0xa4a   : > { %1074 = vrot.lane.b32.xlu0 %v1563_v42, %s1579_s7 }
 0xa4d   : > { %v1565_v43 = vpop.eup %1564 }
 0xa4e   : > { %1175 = vrot.lane.b32.xlu1 %v1565_v43, %s1579_s7 }
 0xa52   : > { %1185 = vrot.lane.b32.xlu1 %v1071_v5, %s1580_s9 }
 0xa56   : > { %1195 = vrot.lane.b32.xlu1 %v1172_v41, %s1580_s9 }
 0xabc   : > { %v1075_v44 = vpop.permute.xlu0 %1074 }
 0xabd   : > { %v1077_v45 = vmul.f32 %v1075_v44, %v1056_v28 }
 0xabf   : > { %1180 = vrot.lane.b32.xlu0 %v1077_v45, %s1578_s6 }
 0xac0   : > { %v1176_v13 = vpop.permute.xlu1 %1175 }
 0xac1   : > { %v1178_v9 = vmul.f32 %v1176_v13, %v1157_v32 }
 0xac3   : > { %1190 = vrot.lane.b32.xlu0 %v1178_v9, %s1578_s6 }
 0xac4   : > { %v1186_v4 = vpop.permute.xlu1 %1185 }
 0xac5   : > { %1188 = vst.msk [vmem:[#allocation3] sm:$0xff] %vm296_vm2, %v1186_v4 }
 0xac8   : > { %v1196_v10 = vpop.permute.xlu1 %1195 }
 0xac9   : > { %1198 = vst.msk [vmem:[#allocation5] sm:$0xff] %vm296_vm2, %v1196_v10 }
 0xb31   : > { %v1181_v15 = vpop.permute.xlu0 %1180 }
 0xb32   : > { %1183 = vst.msk [vmem:[#allocation2] sm:$0xff] %vm296_vm2, %v1181_v15  ;;  %1340 = vst.msk [vmem:[%s1632_s8 + $0x18] sm:$0xff] %vm296_vm2, %v1181_v15 }
 0xb35   : > { %v1191_v46 = vpop.permute.xlu0 %1190 }
 0xb36   : > { %1193 = vst.msk [vmem:[#allocation4] sm:$0xff] %vm296_vm2, %v1191_v46  ;;  %1201 = vst.msk [vmem:[%s1637_s11] sm:$0xff] %vm296_vm2, %v1191_v46 }
 0xb37 PF: > { %s16_s18 = sadd.s32 1, %s1572_s18  }
 0xb38   : > { %p13_p6 = scmp.ge.s32.totalorder %s16_s18, 4  }
 0xb3a   :  { %15 = sbr.rel (!%p13_p6) target bundleno = 1 (0x1), region = 97 }

</bundles_post_ra>
